<compile_context>
chip_gen: v7x
topology: tpu7x:2x2x1
jax: 0.10.0
libtpu: 0.0.40
codegen_flags: <defaults>
</compile_context>

<pallas_src>
import functools

import jax
import jax.numpy as jnp
import numpy as np
from jax import lax
from jax.experimental import pallas as pl
from jax.experimental.pallas import tpu as pltpu

BN_EPS = 1e-5


def _cdiv(a, b):
    return (a + b - 1) // b


def _round_up(x, m):
    return ((x + m - 1) // m) * m


def _pointnet_pool_kernel(h1_ref, w2_ref, c2_ref, w3_ref, o_ref, acc_ref, *,
                          chunk):
    """Grid = (B, point_splits, tiles_per_split).

    h1_ref : (1, TN, 64)   conv1+bn1+relu activations (bf16 or f32)
    w2_ref : (64, 128)     folded conv2+bn2 weight
    c2_ref : (1, 128)      folded conv2+bn2 shift (f32)
    w3_ref : (128, L)      folded conv3+bn3 weight (shift added post-pool)
    o_ref  : (1, 1, L)     per-(batch, split) partial max output
    acc_ref: (8, L) f32    running partial max scratch
    """
    n = pl.program_id(2)

    @pl.when(n == 0)
    def _():
        acc_ref[...] = jnp.full(acc_ref.shape, -jnp.inf, acc_ref.dtype)

    w2 = w2_ref[...]
    c2 = c2_ref[...]
    w3 = w3_ref[...]

    tn = h1_ref.shape[1]
    num_chunks = tn // chunk            # tn is padded to a multiple of chunk

    def body(i, carry):
        start = pl.multiple_of(i * chunk, chunk)
        h1c = h1_ref[0, pl.ds(start, chunk), :]                  # (chunk, 64)

        # conv2 + bn2 + relu (BN folded into w2/c2)
        h2 = jnp.dot(h1c, w2, preferred_element_type=jnp.float32)
        h2 = jnp.maximum(h2 + c2, 0.0)

        # conv3 + bn3 scale; the per-channel shift c3 commutes with the max
        # pool and is added once in the wrapper.
        h3 = jnp.dot(h2.astype(w3.dtype), w3,
                     preferred_element_type=jnp.float32)         # (chunk, L)

        # Partial max pool on the VPU: fold chunk rows down to 8 with
        # element-wise vreg maxima; the single expensive 8 -> 1 cross-sublane
        # (XLU) reduce happens once per (batch, split) at finalize.
        part = h3[0:8, :]
        for j in range(1, chunk // 8):
            part = jnp.maximum(part, h3[j * 8:(j + 1) * 8, :])
        acc_ref[...] = jnp.maximum(acc_ref[...], part)
        return carry

    lax.fori_loop(0, num_chunks, body, 0, unroll=True)

    @pl.when(n == pl.num_programs(2) - 1)
    def _():
        o_ref[0] = acc_ref[...].max(axis=0, keepdims=True).astype(o_ref.dtype)


def _fold_bn(w, b, gamma, beta, rmean, rvar):
    """Fold eval-mode BatchNorm1d into a (in, out) weight + (1, out) shift."""
    s = gamma / jnp.sqrt(rvar + BN_EPS)          # (out,)
    w_f = w * s[None, :]                         # (in, out)
    c_f = (b - rmean) * s + beta                 # (out,)
    return w_f.astype(jnp.float32), c_f[None, :].astype(jnp.float32)


@functools.partial(
    jax.jit,
    static_argnames=("max_tile_n", "point_splits", "chunk", "use_bf16"))
def pointnetfeat_forward(x_bnc, params, *, max_tile_n=4096, point_splits=None,
                         chunk=256, use_bf16=True):
    """x_bnc: (B, N, 3) float32 -> (B, nlatent) float32 (eval-mode BN)."""
    B, N, _ = x_bnc.shape
    nlatent = params["w3"].shape[1]
    assert chunk % 16 == 0 and max_tile_n % chunk == 0

    # point_splits: only useful to feed both v7x TensorCores when the batch
    # axis can't (B == 1).  Single-TC chips (v5e/v6e) and batched runs keep
    # the full per-batch tile (fewer steps, one finalize).
    if point_splits is None:
        point_splits = 2 if B == 1 else 1

    w1, c1 = _fold_bn(params["w1"], params["b1"], *params["bn1"])
    w2, c2 = _fold_bn(params["w2"], params["b2"], *params["bn2"])
    w3, c3 = _fold_bn(params["w3"], params["b3"], *params["bn3"])
    wl, cl = _fold_bn(params["wl"], params["bl"], *params["bn4"])

    mm_dtype = jnp.bfloat16 if use_bf16 else jnp.float32

    # Layer 1 (3 -> 64) in the wrapper: avoids the lane-3 input tile and the
    # K=3 MXU matmul inside the kernel; cast to bf16 BEFORE padding so the
    # pad copy and the streamed kernel input are half-width.
    h1 = jnp.maximum(x_bnc @ w1 + c1, 0.0).astype(mm_dtype)      # (B, N, 64)

    # Point-axis tiling: one tile per (batch, split) whenever it fits the cap;
    # tn is rounded up to a multiple of the in-kernel chunk.
    per_split = _cdiv(N, point_splits)
    tiles_per_split = max(1, _cdiv(per_split, max_tile_n))
    tn = _round_up(_cdiv(per_split, tiles_per_split), chunk)
    n_pad = point_splits * tiles_per_split * tn
    if n_pad != N:
        # Edge-replicate real points (safe for max pooling, unlike zero-pad).
        h1 = jnp.pad(h1, ((0, 0), (0, n_pad - N), (0, 0)), mode="edge")

    w2m = w2.astype(mm_dtype)
    w3m = w3.astype(mm_dtype)

    def const_spec(arr):
        # Constant-index weight blocks: single-buffer (index never changes).
        return pl.BlockSpec(arr.shape, lambda b, s, n: (0,) * arr.ndim,
                            pipeline_mode=pl.Buffered(1))

    grid_spec = pltpu.PrefetchScalarGridSpec(
        num_scalar_prefetch=0,
        grid=(B, point_splits, tiles_per_split),
        in_specs=[
            pl.BlockSpec((1, tn, 64),
                         lambda b, s, n: (b, s * tiles_per_split + n, 0)),
            const_spec(w2m), const_spec(c2), const_spec(w3m),
        ],
        out_specs=pl.BlockSpec((1, 1, nlatent), lambda b, s, n: (b, s, 0)),
        scratch_shapes=[pltpu.VMEM((8, nlatent), jnp.float32)],
    )

    flops = 2 * B * n_pad * (64 * 128 + 128 * nlatent)
    bytes_accessed = (h1.size * h1.dtype.itemsize
                      + w2m.size * w2m.dtype.itemsize
                      + c2.size * c2.dtype.itemsize
                      + w3m.size * w3m.dtype.itemsize
                      + B * point_splits * nlatent * 4)

    pooled_parts = pl.pallas_call(
        functools.partial(_pointnet_pool_kernel, chunk=chunk),
        out_shape=jax.ShapeDtypeStruct((B, point_splits, nlatent), jnp.float32),
        grid_spec=grid_spec,
        compiler_params=pltpu.CompilerParams(
            dimension_semantics=("parallel", "parallel", "arbitrary"),
            vmem_limit_bytes=32 * 1024 * 1024),
        cost_estimate=pl.CostEstimate(flops=flops, transcendentals=0,
                                      bytes_accessed=bytes_accessed),
    )(h1, w2m, c2, w3m)

    # Combine per-split partial maxima, add the conv3+bn3 shift once, then the
    # final linear (+bn4 folded) + relu at full MXU M-fill via XLA.
    pooled = pooled_parts.max(axis=1) + c3                       # (B, nlatent)
    return jnp.maximum(pooled @ wl + cl, 0.0)


def pointnetfeat_reference(x_bnc, params):
    """Pure-JAX f32 reference (same eval-mode BN semantics as the PyTorch module)."""
    def bn(h, stats):
        gamma, beta, rmean, rvar = stats
        return (h - rmean) / jnp.sqrt(rvar + BN_EPS) * gamma + beta

    h = jax.nn.relu(bn(x_bnc @ params["w1"] + params["b1"], params["bn1"]))
    h = jax.nn.relu(bn(h @ params["w2"] + params["b2"], params["bn2"]))
    h = bn(h @ params["w3"] + params["b3"], params["bn3"])
    pooled = h.max(axis=1)                                       # (B, nlatent)
    y = bn(pooled @ params["wl"] + params["bl"], params["bn4"])
    return jax.nn.relu(y)


def make_params(key, nlatent=256):
    """Deterministic synthetic parameters matching PointNetfeat's shapes.

    Conv1d(in, out, 1) weights are stored transposed as (in, out) so the
    forward computes x @ W directly.  BN layers use eval-mode running stats.
    """
    ks = jax.random.split(key, 24)
    dims = [(3, 64), (64, 128), (128, nlatent), (nlatent, nlatent)]
    names = ["1", "2", "3", "l"]
    p = {}
    i = 0
    for (cin, cout), nm in zip(dims, names):
        p["w" + nm] = jax.random.normal(ks[i], (cin, cout), jnp.float32) * 0.1; i += 1
        p["b" + nm] = jax.random.normal(ks[i], (cout,), jnp.float32) * 0.05;    i += 1
    for bn_name, cout in zip(["bn1", "bn2", "bn3", "bn4"],
                             [64, 128, nlatent, nlatent]):
        gamma = 1.0 + 0.1 * jax.random.normal(ks[i], (cout,), jnp.float32); i += 1
        beta = 0.05 * jax.random.normal(ks[i], (cout,), jnp.float32);       i += 1
        rmean = 0.05 * jax.random.normal(ks[i], (cout,), jnp.float32);      i += 1
        rvar = jax.random.uniform(ks[i], (cout,), jnp.float32, 0.5, 1.5);   i += 1
        p[bn_name] = (gamma, beta, rmean, rvar)
    return p


if __name__ == "__main__":
    # TODO(synk): training-mode BatchNorm (batch statistics) not implemented;
    # this reproduces the eval/inference-mode forward pass.
    key = jax.random.PRNGKey(0)
    k_x, k_x2, k_p = jax.random.split(key, 3)

    NLATENT = 256                        # small stand-in for nlatent=1024
    params = make_params(k_p, nlatent=NLATENT)

    # Test 1: B=2, ragged N -> exercises edge-replicate padding (tn rounds up
    # to the 256-row chunk) with point_splits auto-selected to 1.
    B, N = 2, 250
    x = jax.random.normal(k_x, (B, N, 3), jnp.float32)
    out = jax.block_until_ready(pointnetfeat_forward(x, params))
    ref = jax.block_until_ready(pointnetfeat_reference(x, params))
    # bf16 matmul operands in the kernel path -> bf16-level tolerance vs f32 ref.
    np.testing.assert_allclose(np.asarray(out), np.asarray(ref),
                               rtol=2e-2, atol=2e-2)
    assert out.shape == (B, NLATENT)

    # Test 2: B=1 -> point_splits auto-selects 2; exercises the per-split
    # partial-max combine path (and padding again).
    x2 = jax.random.normal(k_x2, (1, 300, 3), jnp.float32)
    out2 = jax.block_until_ready(pointnetfeat_forward(x2, params))
    ref2 = jax.block_until_ready(pointnetfeat_reference(x2, params))
    np.testing.assert_allclose(np.asarray(out2), np.asarray(ref2),
                               rtol=2e-2, atol=2e-2)
    assert out2.shape == (1, NLATENT)

    print("KERNEL_OK")
</pallas_src>

<mosaic_0001>
module attributes {stable_mosaic.version = 11 : i64} {
  func.func @_pointnet_pool_kernel(%arg0: i32, %arg1: i32, %arg2: i32, %arg3: memref<1x256x64xbf16, #tpu.memory_space<vmem>>, %arg4: memref<64x128xbf16, #tpu.memory_space<vmem>>, %arg5: memref<1x128xf32, #tpu.memory_space<vmem>>, %arg6: memref<128x256xbf16, #tpu.memory_space<vmem>>, %arg7: memref<1x1x256xf32, #tpu.memory_space<vmem>>, %arg8: memref<8x256xf32, #tpu.memory_space<vmem>>) attributes {dimension_semantics = [#tpu.dimension_semantics<parallel>, #tpu.dimension_semantics<parallel>, #tpu.dimension_semantics<arbitrary>], iteration_bounds = array<i64: 2, 1, 1>, scalar_prefetch = 0 : i64, scratch_operands = 1 : i64, tpu.core_type = #tpu.core_type<tc>, window_params = [{transform_indices = @transform_0, window_bounds = array<i64: 1, 256, 64>}, {pipeline_mode = #tpu.pipeline_mode<synchronous>, transform_indices = @transform_1, window_bounds = array<i64: 64, 128>}, {pipeline_mode = #tpu.pipeline_mode<synchronous>, transform_indices = @transform_2, window_bounds = array<i64: 1, 128>}, {pipeline_mode = #tpu.pipeline_mode<synchronous>, transform_indices = @transform_3, window_bounds = array<i64: 128, 256>}, {transform_indices = @transform_4, window_bounds = array<i64: 1, 1, 256>}]} {
    %c0_i32 = arith.constant 0 : i32
    %0 = arith.cmpi eq, %arg2, %c0_i32 : i32
    %1 = arith.extui %0 : i1 to i32
    %c0_i32_0 = arith.constant 0 : i32
    %2 = arith.cmpi ne, %1, %c0_i32_0 : i32
    scf.if %2 {
      %cst_17 = arith.constant 0xFF800000 : f32
      %87 = vector.broadcast %cst_17 : f32 to vector<8x256xf32>
      %c0_18 = arith.constant 0 : index
      %c0_19 = arith.constant 0 : index
      %88 = vector.load %arg8[%c0_18, %c0_19] : memref<8x256xf32, #tpu.memory_space<vmem>>, vector<8x256xf32>
      tpu.vector_store %arg8[%c0_18, %c0_19], %87 {strides = array<i32>} : memref<8x256xf32, #tpu.memory_space<vmem>>, vector<8x256xf32>,
    } else {
    }
    %c0 = arith.constant 0 : index
    %c0_1 = arith.constant 0 : index
    %3 = vector.load %arg4[%c0, %c0_1] : memref<64x128xbf16, #tpu.memory_space<vmem>>, vector<64x128xbf16>
    %c0_2 = arith.constant 0 : index
    %c0_3 = arith.constant 0 : index
    %4 = vector.load %arg5[%c0_2, %c0_3] : memref<1x128xf32, #tpu.memory_space<vmem>>, vector<1x128xf32>
    %c0_4 = arith.constant 0 : index
    %c0_5 = arith.constant 0 : index
    %5 = vector.load %arg6[%c0_4, %c0_5] : memref<128x256xbf16, #tpu.memory_space<vmem>>, vector<128x256xbf16>
    %c0_i32_6 = arith.constant 0 : i32
    %c256_i32 = arith.constant 256 : i32
    %6 = arith.muli %c0_i32_6, %c256_i32 : i32
    %7 = tpu.assume_multiple %6, 256 : i32
    %c0_7 = arith.constant 0 : index
    %8 = arith.index_cast %7 : i32 to index
    %c0_8 = arith.constant 0 : index
    %9 = vector.load %arg3[%c0_7, %8, %c0_8] : memref<1x256x64xbf16, #tpu.memory_space<vmem>>, vector<1x256x64xbf16>
    %10 = vector.shape_cast %9 : vector<1x256x64xbf16> to vector<256x64xbf16>
    %cst = arith.constant dense<0.000000e+00> : vector<256x128xf32>
    %11 = tpu.matmul %10, %3, %cst {dimension_numbers = #tpu.dot_dimension_numbers<[1], [0], [0], [1], [0, 0, 1, 1], [], []>} : vector<256x64xbf16>, vector<64x128xbf16>, vector<256x128xf32> -> vector<256x128xf32>
    %12 = vector.broadcast %4 : vector<1x128xf32> to vector<256x128xf32>
    %13 = arith.addf %11, %12 : vector<256x128xf32>
    %cst_9 = arith.constant 0.000000e+00 : f32
    %14 = vector.broadcast %cst_9 : f32 to vector<256x128xf32>
    %15 = arith.maximumf %13, %14 : vector<256x128xf32>
    %16 = arith.truncf %15 : vector<256x128xf32> to vector<256x128xbf16>
    %cst_10 = arith.constant dense<0.000000e+00> : vector<256x256xf32>
    %17 = tpu.matmul %16, %5, %cst_10 {dimension_numbers = #tpu.dot_dimension_numbers<[1], [0], [0], [1], [0, 0, 1, 1], [], []>} : vector<256x128xbf16>, vector<128x256xbf16>, vector<256x256xf32> -> vector<256x256xf32>
    %18 = vector.extract_strided_slice %17 {offsets = [0, 0], sizes = [8, 256], strides = [1, 1]} : vector<256x256xf32> to vector<8x256xf32>
    %19 = vector.extract_strided_slice %17 {offsets = [8, 0], sizes = [8, 256], strides = [1, 1]} : vector<256x256xf32> to vector<8x256xf32>
    %20 = arith.maximumf %18, %19 : vector<8x256xf32>
    %21 = vector.extract_strided_slice %17 {offsets = [16, 0], sizes = [8, 256], strides = [1, 1]} : vector<256x256xf32> to vector<8x256xf32>
    %22 = arith.maximumf %20, %21 : vector<8x256xf32>
    %23 = vector.extract_strided_slice %17 {offsets = [24, 0], sizes = [8, 256], strides = [1, 1]} : vector<256x256xf32> to vector<8x256xf32>
    %24 = arith.maximumf %22, %23 : vector<8x256xf32>
    %25 = vector.extract_strided_slice %17 {offsets = [32, 0], sizes = [8, 256], strides = [1, 1]} : vector<256x256xf32> to vector<8x256xf32>
    %26 = arith.maximumf %24, %25 : vector<8x256xf32>
    %27 = vector.extract_strided_slice %17 {offsets = [40, 0], sizes = [8, 256], strides = [1, 1]} : vector<256x256xf32> to vector<8x256xf32>
    %28 = arith.maximumf %26, %27 : vector<8x256xf32>
    %29 = vector.extract_strided_slice %17 {offsets = [48, 0], sizes = [8, 256], strides = [1, 1]} : vector<256x256xf32> to vector<8x256xf32>
    %30 = arith.maximumf %28, %29 : vector<8x256xf32>
    %31 = vector.extract_strided_slice %17 {offsets = [56, 0], sizes = [8, 256], strides = [1, 1]} : vector<256x256xf32> to vector<8x256xf32>
    %32 = arith.maximumf %30, %31 : vector<8x256xf32>
    %33 = vector.extract_strided_slice %17 {offsets = [64, 0], sizes = [8, 256], strides = [1, 1]} : vector<256x256xf32> to vector<8x256xf32>
    %34 = arith.maximumf %32, %33 : vector<8x256xf32>
    %35 = vector.extract_strided_slice %17 {offsets = [72, 0], sizes = [8, 256], strides = [1, 1]} : vector<256x256xf32> to vector<8x256xf32>
    %36 = arith.maximumf %34, %35 : vector<8x256xf32>
    %37 = vector.extract_strided_slice %17 {offsets = [80, 0], sizes = [8, 256], strides = [1, 1]} : vector<256x256xf32> to vector<8x256xf32>
    %38 = arith.maximumf %36, %37 : vector<8x256xf32>
    %39 = vector.extract_strided_slice %17 {offsets = [88, 0], sizes = [8, 256], strides = [1, 1]} : vector<256x256xf32> to vector<8x256xf32>
    %40 = arith.maximumf %38, %39 : vector<8x256xf32>
    %41 = vector.extract_strided_slice %17 {offsets = [96, 0], sizes = [8, 256], strides = [1, 1]} : vector<256x256xf32> to vector<8x256xf32>
    %42 = arith.maximumf %40, %41 : vector<8x256xf32>
    %43 = vector.extract_strided_slice %17 {offsets = [104, 0], sizes = [8, 256], strides = [1, 1]} : vector<256x256xf32> to vector<8x256xf32>
    %44 = arith.maximumf %42, %43 : vector<8x256xf32>
    %45 = vector.extract_strided_slice %17 {offsets = [112, 0], sizes = [8, 256], strides = [1, 1]} : vector<256x256xf32> to vector<8x256xf32>
    %46 = arith.maximumf %44, %45 : vector<8x256xf32>
    %47 = vector.extract_strided_slice %17 {offsets = [120, 0], sizes = [8, 256], strides = [1, 1]} : vector<256x256xf32> to vector<8x256xf32>
    %48 = arith.maximumf %46, %47 : vector<8x256xf32>
    %49 = vector.extract_strided_slice %17 {offsets = [128, 0], sizes = [8, 256], strides = [1, 1]} : vector<256x256xf32> to vector<8x256xf32>
    %50 = arith.maximumf %48, %49 : vector<8x256xf32>
    %51 = vector.extract_strided_slice %17 {offsets = [136, 0], sizes = [8, 256], strides = [1, 1]} : vector<256x256xf32> to vector<8x256xf32>
    %52 = arith.maximumf %50, %51 : vector<8x256xf32>
    %53 = vector.extract_strided_slice %17 {offsets = [144, 0], sizes = [8, 256], strides = [1, 1]} : vector<256x256xf32> to vector<8x256xf32>
    %54 = arith.maximumf %52, %53 : vector<8x256xf32>
    %55 = vector.extract_strided_slice %17 {offsets = [152, 0], sizes = [8, 256], strides = [1, 1]} : vector<256x256xf32> to vector<8x256xf32>
    %56 = arith.maximumf %54, %55 : vector<8x256xf32>
    %57 = vector.extract_strided_slice %17 {offsets = [160, 0], sizes = [8, 256], strides = [1, 1]} : vector<256x256xf32> to vector<8x256xf32>
    %58 = arith.maximumf %56, %57 : vector<8x256xf32>
    %59 = vector.extract_strided_slice %17 {offsets = [168, 0], sizes = [8, 256], strides = [1, 1]} : vector<256x256xf32> to vector<8x256xf32>
    %60 = arith.maximumf %58, %59 : vector<8x256xf32>
    %61 = vector.extract_strided_slice %17 {offsets = [176, 0], sizes = [8, 256], strides = [1, 1]} : vector<256x256xf32> to vector<8x256xf32>
    %62 = arith.maximumf %60, %61 : vector<8x256xf32>
    %63 = vector.extract_strided_slice %17 {offsets = [184, 0], sizes = [8, 256], strides = [1, 1]} : vector<256x256xf32> to vector<8x256xf32>
    %64 = arith.maximumf %62, %63 : vector<8x256xf32>
    %65 = vector.extract_strided_slice %17 {offsets = [192, 0], sizes = [8, 256], strides = [1, 1]} : vector<256x256xf32> to vector<8x256xf32>
    %66 = arith.maximumf %64, %65 : vector<8x256xf32>
    %67 = vector.extract_strided_slice %17 {offsets = [200, 0], sizes = [8, 256], strides = [1, 1]} : vector<256x256xf32> to vector<8x256xf32>
    %68 = arith.maximumf %66, %67 : vector<8x256xf32>
    %69 = vector.extract_strided_slice %17 {offsets = [208, 0], sizes = [8, 256], strides = [1, 1]} : vector<256x256xf32> to vector<8x256xf32>
    %70 = arith.maximumf %68, %69 : vector<8x256xf32>
    %71 = vector.extract_strided_slice %17 {offsets = [216, 0], sizes = [8, 256], strides = [1, 1]} : vector<256x256xf32> to vector<8x256xf32>
    %72 = arith.maximumf %70, %71 : vector<8x256xf32>
    %73 = vector.extract_strided_slice %17 {offsets = [224, 0], sizes = [8, 256], strides = [1, 1]} : vector<256x256xf32> to vector<8x256xf32>
    %74 = arith.maximumf %72, %73 : vector<8x256xf32>
    %75 = vector.extract_strided_slice %17 {offsets = [232, 0], sizes = [8, 256], strides = [1, 1]} : vector<256x256xf32> to vector<8x256xf32>
    %76 = arith.maximumf %74, %75 : vector<8x256xf32>
    %77 = vector.extract_strided_slice %17 {offsets = [240, 0], sizes = [8, 256], strides = [1, 1]} : vector<256x256xf32> to vector<8x256xf32>
    %78 = arith.maximumf %76, %77 : vector<8x256xf32>
    %79 = vector.extract_strided_slice %17 {offsets = [248, 0], sizes = [8, 256], strides = [1, 1]} : vector<256x256xf32> to vector<8x256xf32>
    %80 = arith.maximumf %78, %79 : vector<8x256xf32>
    %c0_11 = arith.constant 0 : index
    %c0_12 = arith.constant 0 : index
    %81 = vector.load %arg8[%c0_11, %c0_12] : memref<8x256xf32, #tpu.memory_space<vmem>>, vector<8x256xf32>
    %82 = arith.maximumf %81, %80 : vector<8x256xf32>
    %c0_13 = arith.constant 0 : index
    %c0_14 = arith.constant 0 : index
    %83 = vector.load %arg8[%c0_13, %c0_14] : memref<8x256xf32, #tpu.memory_space<vmem>>, vector<8x256xf32>
    tpu.vector_store %arg8[%c0_13, %c0_14], %82 {strides = array<i32>} : memref<8x256xf32, #tpu.memory_space<vmem>>, vector<8x256xf32>,
    %c1_i32 = arith.constant 1 : i32
    %c0_i32_15 = arith.constant 0 : i32
    %84 = arith.cmpi eq, %arg2, %c0_i32_15 : i32
    %85 = arith.extui %84 : i1 to i32
    %c0_i32_16 = arith.constant 0 : i32
    %86 = arith.cmpi ne, %85, %c0_i32_16 : i32
    scf.if %86 {
      %c0_17 = arith.constant 0 : index
      %c0_18 = arith.constant 0 : index
      %87 = vector.load %arg8[%c0_17, %c0_18] : memref<8x256xf32, #tpu.memory_space<vmem>>, vector<8x256xf32>
      %cst_19 = arith.constant dense<0xFF800000> : vector<256xf32>
      %88 = vector.multi_reduction <maximumf>, %87, %cst_19 [0] : vector<8x256xf32> to vector<256xf32>
      %89 = vector.shape_cast %88 : vector<256xf32> to vector<1x256xf32>
      %c0_20 = arith.constant 0 : index
      %c0_21 = arith.constant 0 : index
      %c0_22 = arith.constant 0 : index
      %90 = vector.load %arg7[%c0_20, %c0_21, %c0_22] : memref<1x1x256xf32, #tpu.memory_space<vmem>>, vector<1x1x256xf32>
      %91 = vector.shape_cast %90 : vector<1x1x256xf32> to vector<1x256xf32>
      %92 = vector.shape_cast %89 : vector<1x256xf32> to vector<1x1x256xf32>
      tpu.vector_store %arg7[%c0_20, %c0_21, %c0_22], %92 {strides = array<i32>} : memref<1x1x256xf32, #tpu.memory_space<vmem>>, vector<1x1x256xf32>,
    } else {
    }
    return
  }
  func.func @transform_0(%arg0: i32, %arg1: i32, %arg2: i32) -> (i32, i32, i32) {
    %c1_i32 = arith.constant 1 : i32
    %0 = arith.muli %arg1, %c1_i32 : i32
    %1 = arith.addi %0, %arg2 : i32
    %c0_i32 = arith.constant 0 : i32
    %c0_i32_0 = arith.constant 0 : i32
    return %arg0, %1, %c0_i32 : i32, i32, i32
  }
  func.func @transform_1(%arg0: i32, %arg1: i32, %arg2: i32) -> (i32, i32) {
    %c0_i32 = arith.constant 0 : i32
    %c0_i32_0 = arith.constant 0 : i32
    %c0_i32_1 = arith.constant 0 : i32
    return %c0_i32, %c0_i32_0 : i32, i32
  }
  func.func @transform_2(%arg0: i32, %arg1: i32, %arg2: i32) -> (i32, i32) {
    %c0_i32 = arith.constant 0 : i32
    %c0_i32_0 = arith.constant 0 : i32
    %c0_i32_1 = arith.constant 0 : i32
    return %c0_i32, %c0_i32_0 : i32, i32
  }
  func.func @transform_3(%arg0: i32, %arg1: i32, %arg2: i32) -> (i32, i32) {
    %c0_i32 = arith.constant 0 : i32
    %c0_i32_0 = arith.constant 0 : i32
    %c0_i32_1 = arith.constant 0 : i32
    return %c0_i32, %c0_i32_0 : i32, i32
  }
  func.func @transform_4(%arg0: i32, %arg1: i32, %arg2: i32) -> (i32, i32, i32) {
    %c0_i32 = arith.constant 0 : i32
    %c0_i32_0 = arith.constant 0 : i32
    return %arg0, %arg1, %c0_i32 : i32, i32, i32
  }
}

</mosaic_0001>

<bundles_post_ra>
// kernel: pointnetfeat_forward.1
= control target key start
LH: loop header
LB: loop body
LE: loop exit
PB: predicated region body
PF: predicated region fallthrough
CT: control target
= control target key end

     0   :  { %s1408_s15 = smov 0   ;;  %s1410_s16 = smov 0   ;;  %s1592_s0 = inlined_call_operand.vmem [shape: bf16[2,256,64], index: 0, kind: input, shape index: {}]   ;;  %s1593_s1 = inlined_call_operand.vmem [shape: bf16[64,128], index: 1, kind: input, shape index: {}]   ;;  %s1594_s2 = inlined_call_operand.vmem [shape: f32[1,128], index: 2, kind: input, shape index: {}]   ;;  %s1595_s3 = inlined_call_operand.vmem [shape: bf16[128,256], index: 3, kind: input, shape index: {}]   ;;  %s1596_s4 = inlined_call_operand.vmem [shape: f32[2,1,256], index: 4, kind: output, shape index: {}]  }
   0x1   :  { %s1412_s17 = smov 0  }
   0x2 LB: > { %s33_s18 = sadd.s32 1, %s1375_s16  ;;  %p1151_p0 = scmp.ge.s32.totalorder %s1379_s17, 1  ;;  %s1379_s17 = sphi %s1412_s17, %s14_s17   ;;  %s1375_s16 = sphi %s1410_s16, %s1598_s16   ;;  %s1371_s15 = sphi %s1408_s15, %s1597_s15  }
   0x3   : > { %p35_p1 = scmp.ge.s32.totalorder %s33_s18, 2  ;;  %p194_p2 = scmp.lt.s32.totalorder %s1379_s17, 3 }
   0x5   : > { %s1600_s18 = smov (%p35_p1, %s33_s18), 0  ;;  %p195_p3 = pnand %p1151_p0, %p194_p2 }
   0x6   : > { %v1313_v0 = vld [vmem:[%s1593_s1] sm:$0xff] (!%p195_p3)   ;;  %p230_p4 = scmp.lt.s32.totalorder (!%p195_p3), %s1371_s15, 1  ;;  %v1314_v1 = vld [vmem:[%s1593_s1 + $0x8] sm:$0xff] (!%p195_p3)   ;;  %v1315_v2 = vld [vmem:[%s1593_s1 + $0x10] sm:$0xff] (!%p195_p3)   ;;  %vm422_vm0 = vcmask (!%p195_p3), 523264   ;;  %v1381_v36 = vmov (!%p195_p3), 0  }
   0x7   : > { %198 = sbr.rel (%p195_p3) target bundleno = 576 (0x240), region = 36  ;;  %1231 = vmatprep.subr.bf16.mxu0 (!%p195_p3), %v1313_v0  ;;  %v1335_v3 = vld [vmem:[%s1595_s3 + $0x4] ss:$8 sps:$4 sm:$0xff] (!%p195_p3)   ;;  %v1333_v5 = vld [vmem:[%s1595_s3] ss:$8 sps:$4 sm:$0xff] (!%p195_p3)   ;;  %v1316_v6 = vld [vmem:[%s1593_s1 + $0x18] sm:$0xff] (!%p195_p3)   ;;  %842 = vmatprep.mubr.bf16.mxu1 (!%p195_p3), %v1381_v36 }
   0x8   : > { %1232 = vmatpush3.bf16.msra.mxu0 (!%p195_p3), %v1313_v0  ;;  %1271 = vmatprep.subr.bf16.mxu1 (!%p195_p3), %v1335_v3  ;;  %v1336_v10 = vld [vmem:[%s1595_s3 + $0x10] ss:$8 sps:$4 sm:$0xff] (!%p195_p3)   ;;  %v1338_v11 = vld [vmem:[%s1595_s3 + $0x14] ss:$8 sps:$4 sm:$0xff] (!%p195_p3)   ;;  %v1341_v13 = vld [vmem:[%s1595_s3 + $0x24] ss:$8 sps:$4 sm:$0xff] (!%p195_p3)  }
   0x9   : > { %1233 = vmatprep.subr.bf16.mxu0 (!%p195_p3), %v1314_v1  ;;  %1279 = vmatpush1.bf16.msra.mxu1 (!%p195_p3), %v1333_v5  ;;  %v1339_v14 = vld [vmem:[%s1595_s3 + $0x20] ss:$8 sps:$4 sm:$0xff] (!%p195_p3)   ;;  %v1344_v15 = vld [vmem:[%s1595_s3 + $0x34] ss:$8 sps:$4 sm:$0xff] (!%p195_p3)   ;;  %v1342_v16 = vld [vmem:[%s1595_s3 + $0x30] ss:$8 sps:$4 sm:$0xff] (!%p195_p3)  }
   0xa   : > { %1272 = vmatprep.subr.bf16.mxu1 (!%p195_p3), %v1338_v11  ;;  %v1347_v18 = vld [vmem:[%s1595_s3 + $0x44] ss:$8 sps:$4 sm:$0xff] (!%p195_p3)   ;;  %v1345_v20 = vld [vmem:[%s1595_s3 + $0x40] ss:$8 sps:$4 sm:$0xff] (!%p195_p3)   ;;  %v1350_v21 = vld [vmem:[%s1595_s3 + $0x54] ss:$8 sps:$4 sm:$0xff] (!%p195_p3)  }
   0xb   : > { %v1348_v22 = vld [vmem:[%s1595_s3 + $0x50] ss:$8 sps:$4 sm:$0xff] (!%p195_p3)   ;;  %v1353_v32 = vld [vmem:[%s1595_s3 + $0x64] ss:$8 sps:$4 sm:$0xff] (!%p195_p3)   ;;  %v1351_v33 = vld [vmem:[%s1595_s3 + $0x60] ss:$8 sps:$4 sm:$0xff] (!%p195_p3)  }
   0xc   : > { %1234 = vmatpush3.bf16.msra.mxu0 (!%p195_p3), %v1314_v1  ;;  %v1356_v34 = vld [vmem:[%s1595_s3 + $0x74] ss:$8 sps:$4 sm:$0xff] (!%p195_p3)   ;;  %v1354_v35 = vld [vmem:[%s1595_s3 + $0x70] ss:$8 sps:$4 sm:$0xff] (!%p195_p3)   ;;  %v1531_v37 = vld [vmem:[%s1594_s2] ss:$0 sm:$0xff] (!%p195_p3) }
   0xd   : > { %1235 = vmatprep.subr.bf16.mxu0 (!%p195_p3), %v1315_v2  ;;  %1280 = vmatpush1.bf16.msra.mxu1 (!%p195_p3), %v1336_v10 }
   0xe   : > { %s1602_s15 = smov (!%p230_p4, %s1371_s15), 1  ;;  %1273 = vmatprep.subr.bf16.mxu1 %v1341_v13 }
   0xf   : > { %s1210_s25 = sshll.u32 %s1602_s15, 7  ;;  %s1154_s21 = sshll.u32 %s1602_s15, 1 }
  0x10   : > { %s1441_s28 = scalar_lea.vmem %s1592_s0, %s1210_s25  ;;  %1236 = vmatpush3.bf16.msra.mxu0 %v1315_v2  ;;  %s247_s24 = scalar_lea.vmem %s1596_s4, %s1154_s21 }
  0x11   : > { %v1317_v4 = vld [vmem:[%s1441_s28] sm:$0xff]   ;;  %1237 = vmatprep.subr.bf16.mxu0 %v1316_v6  ;;  %v1318_v7 = vld [vmem:[%s1441_s28 + $0x8] sm:$0xff]   ;;  %v1319_v8 = vld [vmem:[%s1441_s28 + $0x10] sm:$0xff]   ;;  %1281 = vmatpush1.bf16.msra.mxu1 %v1339_v14 }
  0x12   : > { %1239 = vmatprep.mubr.msk.bf16.mxu0 %vm422_vm0, %v1317_v4  ;;  %v1320_v9 = vld [vmem:[%s1441_s28 + $0x18] sm:$0xff]   ;;  %v1321_v12 = vld [vmem:[%s1441_s28 + $0x20] sm:$0xff]   ;;  %v1322_v17 = vld [vmem:[%s1441_s28 + $0x28] sm:$0xff]   ;;  %1274 = vmatprep.subr.bf16.mxu1 %v1344_v15 }
  0x13   : > { %v1323_v19 = vld [vmem:[%s1441_s28 + $0x30] sm:$0xff]   ;;  %v1324_v23 = vld [vmem:[%s1441_s28 + $0x38] sm:$0xff]   ;;  %v1325_v24 = vld [vmem:[%s1441_s28 + $0x40] sm:$0xff]  }
  0x14   : > { %1238 = vmatpush3.bf16.msra.mxu0 %v1316_v6  ;;  %v1326_v25 = vld [vmem:[%s1441_s28 + $0x48] sm:$0xff]   ;;  %v1327_v26 = vld [vmem:[%s1441_s28 + $0x50] sm:$0xff]   ;;  %v1328_v27 = vld [vmem:[%s1441_s28 + $0x58] sm:$0xff]  }
  0x15   : > { %760 = vmatprep.subr.bf16.mxu0 %v1335_v3  ;;  %1282 = vmatpush1.bf16.msra.mxu1 %v1342_v16  ;;  %v1329_v28 = vld [vmem:[%s1441_s28 + $0x60] sm:$0xff]   ;;  %v1330_v29 = vld [vmem:[%s1441_s28 + $0x68] sm:$0xff]   ;;  %v1331_v30 = vld [vmem:[%s1441_s28 + $0x70] sm:$0xff]  }
  0x16   : > { %1275 = vmatprep.subr.bf16.mxu1 %v1347_v18  ;;  %v1332_v31 = vld [vmem:[%s1441_s28 + $0x78] sm:$0xff]  }
  0x17   : > { %1240 = vmatmul.mubr.msk.bf16.vlgmr.msra.gmra.mrb[0].mxu0 %vm422_vm0, %v1318_v7 }
  0x18   : > { %1243 = vmatprep.mubr.msk.bf16.mxu0 %vm422_vm0, %v1319_v8  ;;  %761 = vmatpush1.bf16.msra.mxu0 %v1333_v5 }
  0x19   : > { %762 = vmatprep.subr.bf16.mxu0 %v1338_v11  ;;  %1283 = vmatpush1.bf16.msra.mxu1 %v1345_v20 }
  0x1a   : > { %1276 = vmatprep.subr.bf16.mxu1 %v1350_v21 }
  0x1c   : > { %763 = vmatpush1.bf16.msra.mxu0 %v1336_v10 }
  0x1d   : > { %764 = vmatprep.subr.bf16.mxu0 %v1341_v13  ;;  %1284 = vmatpush1.bf16.msra.mxu1 %v1348_v22 }
  0x1e   : > { %1277 = vmatprep.subr.bf16.mxu1 %v1353_v32 }
  0x1f   : > { %1244 = vmatmul.mubr.msk.bf16.gmra.mrb[4].mxu0 %vm422_vm0, %v1320_v9 }
  0x20   : > { %1247 = vmatprep.mubr.msk.bf16.mxu0 %vm422_vm0, %v1321_v12  ;;  %765 = vmatpush1.bf16.msra.mxu0 %v1339_v14 }
  0x21   : > { %766 = vmatprep.subr.bf16.mxu0 %v1344_v15  ;;  %1285 = vmatpush1.bf16.msra.mxu1 %v1351_v33 }
  0x22   : > { %1278 = vmatprep.subr.bf16.mxu1 %v1356_v34 }
  0x24   : > { %767 = vmatpush1.bf16.msra.mxu0 %v1342_v16 }
  0x25   : > { %768 = vmatprep.subr.bf16.mxu0 %v1347_v18  ;;  %1286 = vmatpush1.bf16.msra.mxu1 %v1354_v35 }
  0x27   : > { %1248 = vmatmul.mubr.msk.bf16.gmra.mrb[8].mxu0 %vm422_vm0, %v1322_v17 }
  0x28   : > { %1251 = vmatprep.mubr.msk.bf16.mxu0 %vm422_vm0, %v1323_v19  ;;  %769 = vmatpush1.bf16.msra.mxu0 %v1345_v20 }
  0x29   : > { %770 = vmatprep.subr.bf16.mxu0 %v1350_v21 }
  0x2c   : > { %771 = vmatpush1.bf16.msra.mxu0 %v1348_v22 }
  0x2d   : > { %772 = vmatprep.subr.bf16.mxu0 %v1353_v32 }
  0x2f   : > { %1252 = vmatmul.mubr.msk.bf16.gmra.mrb[12].mxu0 %vm422_vm0, %v1324_v23 }
  0x30   : > { %1255 = vmatprep.mubr.msk.bf16.mxu0 %vm422_vm0, %v1325_v24  ;;  %773 = vmatpush1.bf16.msra.mxu0 %v1351_v33 }
  0x31   : > { %774 = vmatprep.subr.bf16.mxu0 %v1356_v34 }
  0x34   : > { %775 = vmatpush1.bf16.msra.mxu0 %v1354_v35 }
  0x37   : > { %1256 = vmatmul.mubr.msk.bf16.gmra.mrb[16].mxu0 %vm422_vm0, %v1326_v25 }
  0x38   : > { %1259 = vmatprep.mubr.msk.bf16.mxu0 %vm422_vm0, %v1327_v26 }
  0x3f   : > { %1260 = vmatmul.mubr.msk.bf16.gmra.mrb[20].mxu0 %vm422_vm0, %v1328_v27 }
  0x40   : > { %1263 = vmatprep.mubr.msk.bf16.mxu0 %vm422_vm0, %v1329_v28 }
  0x47   : > { %1264 = vmatmul.mubr.msk.bf16.gmra.mrb[24].mxu0 %vm422_vm0, %v1330_v29 }
  0x48   : > { %1267 = vmatprep.mubr.msk.bf16.mxu0 %vm422_vm0, %v1331_v30 }
  0x4f   : > { %1268 = vmatmul.mubr.msk.bf16.gmra.mrb[28].mxu0 %vm422_vm0, %v1332_v31 }
  0x50   : > { %792 = vmatprep.mubr.bf16.mxu0 %v1381_v36 }
  0xea   : > { %v1241_v38 = vpop.f32.mrb[0].mxu0 }
  0xeb   : > { %v514_v39 = vadd.f32 %v1241_v38, %v1531_v37  ;;  %v505_v40 = vpop.f32.mrb[1].mxu0 }
  0xec   : > { %v506_v41 = vadd.f32 %v1531_v37, %v505_v40  ;;  %v1242_v42 = vpop.f32.mrb[2].mxu0 }
  0xed   : > { %v517_v43 = vadd.f32 %v1242_v42, %v1531_v37  ;;  %v508_v44 = vpop.f32.mrb[3].mxu0  ;;  %v634_v46 = vmax.f32 %v514_v39, 0.0 }
  0xee   : > { %v509_v45 = vadd.f32 %v1531_v37, %v508_v44  ;;  %v632_v48 = vmax.f32 %v506_v41, 0.0 }
  0xef   : > { %v635_v47 = vmax.f32 %v517_v43, 0.0 }
  0xf0   : > { %v633_v49 = vmax.f32 %v509_v45, 0.0 }
  0xf1   : > { %v665_v50 = vpack.c.bf16 %v635_v47, %v634_v46 }
  0xf2   : > { %v664_v51 = vpack.c.bf16 %v633_v49, %v632_v48  ;;  %v1245_v52 = vpop.f32.mrb[4].mxu0 }
  0xf3   : > { %v530_v53 = vadd.f32 %v1245_v52, %v1531_v37  ;;  %v521_v54 = vpop.f32.mrb[5].mxu0 }
  0xf4   : > { %v522_v55 = vadd.f32 %v1531_v37, %v521_v54  ;;  %v1246_v56 = vpop.f32.mrb[6].mxu0  ;;  %793 = vmatmul.mubr.bf16.vlgmr.msra.gmra.mrb[32].mxu0 %v664_v51 }
  0xf5   : > { %v533_v57 = vadd.f32 %v1246_v56, %v1531_v37  ;;  %v524_v58 = vpop.f32.mrb[7].mxu0  ;;  %802 = vmatprep.mubr.bf16.mxu0 %v1381_v36  ;;  %v638_v60 = vmax.f32 %v530_v53, 0.0 }
  0xf6   : > { %v525_v59 = vadd.f32 %v1531_v37, %v524_v58  ;;  %v636_v62 = vmax.f32 %v522_v55, 0.0 }
  0xf7   : > { %v639_v61 = vmax.f32 %v533_v57, 0.0 }
  0xf8   : > { %v637_v63 = vmax.f32 %v525_v59, 0.0 }
  0xf9   : > { %v667_v0 = vpack.c.bf16 %v639_v61, %v638_v60 }
  0xfa   : > { %v666_v1 = vpack.c.bf16 %v637_v63, %v636_v62  ;;  %v1249_v2 = vpop.f32.mrb[8].mxu0 }
  0xfb   : > { %v546_v3 = vadd.f32 %v1249_v2, %v1531_v37  ;;  %v537_v4 = vpop.f32.mrb[9].mxu0 }
  0xfc   : > { %v538_v5 = vadd.f32 %v1531_v37, %v537_v4  ;;  %v1250_v6 = vpop.f32.mrb[10].mxu0  ;;  %803 = vmatmul.mubr.bf16.gmra.mrb[36].mxu0 %v665_v50 }
  0xfd   : > { %v549_v7 = vadd.f32 %v1250_v6, %v1531_v37  ;;  %v540_v8 = vpop.f32.mrb[11].mxu0  ;;  %812 = vmatprep.mubr.bf16.mxu0 %v1381_v36  ;;  %v642_v10 = vmax.f32 %v546_v3, 0.0 }
  0xfe   : > { %v541_v9 = vadd.f32 %v1531_v37, %v540_v8  ;;  %v640_v12 = vmax.f32 %v538_v5, 0.0 }
  0xff   : > { %v643_v11 = vmax.f32 %v549_v7, 0.0 }
 0x100   : > { %v641_v13 = vmax.f32 %v541_v9, 0.0 }
 0x101   : > { %v669_v14 = vpack.c.bf16 %v643_v11, %v642_v10 }
 0x102   : > { %v668_v15 = vpack.c.bf16 %v641_v13, %v640_v12  ;;  %v1253_v16 = vpop.f32.mrb[12].mxu0 }
 0x103   : > { %v562_v17 = vadd.f32 %v1253_v16, %v1531_v37  ;;  %v553_v18 = vpop.f32.mrb[13].mxu0  ;;  %843 = vmatmul.mubr.bf16.vlgmr.msra.gmra.mrb[0].mxu1 %v669_v14 }
 0x104   : > { %v554_v19 = vadd.f32 %v1531_v37, %v553_v18  ;;  %v1254_v20 = vpop.f32.mrb[14].mxu0  ;;  %813 = vmatmul.mubr.bf16.gmra.mrb[40].mxu0 %v666_v1  ;;  %852 = vmatprep.mubr.bf16.mxu1 %v1381_v36 }
 0x105   : > { %v565_v21 = vadd.f32 %v1254_v20, %v1531_v37  ;;  %v556_v22 = vpop.f32.mrb[15].mxu0  ;;  %822 = vmatprep.mubr.bf16.mxu0 %v1381_v36  ;;  %v646_v24 = vmax.f32 %v562_v17, 0.0 }
 0x106   : > { %v557_v23 = vadd.f32 %v1531_v37, %v556_v22  ;;  %v644_v26 = vmax.f32 %v554_v19, 0.0 }
 0x107   : > { %v647_v25 = vmax.f32 %v565_v21, 0.0 }
 0x108   : > { %v645_v27 = vmax.f32 %v557_v23, 0.0 }
 0x109   : > { %v671_v28 = vpack.c.bf16 %v647_v25, %v646_v24 }
 0x10a   : > { %v670_v29 = vpack.c.bf16 %v645_v27, %v644_v26  ;;  %v1257_v30 = vpop.f32.mrb[16].mxu0 }
 0x10b   : > { %v578_v31 = vadd.f32 %v1257_v30, %v1531_v37  ;;  %v569_v32 = vpop.f32.mrb[17].mxu0 }
 0x10c   : > { %823 = vmatmul.mubr.bf16.gmra.mrb[44].mxu0 %v667_v0  ;;  %853 = vmatmul.mubr.bf16.gmra.mrb[4].mxu1 %v670_v29  ;;  %v570_v33 = vadd.f32 %v1531_v37, %v569_v32  ;;  %v1258_v34 = vpop.f32.mrb[18].mxu0 }
 0x10d   : > { %v650_v35 = vmax.f32 %v578_v31, 0.0  ;;  %v581_v38 = vadd.f32 %v1258_v34, %v1531_v37  ;;  %v572_v39 = vpop.f32.mrb[19].mxu0  ;;  %832 = vmatprep.mubr.bf16.mxu0 %v1381_v36  ;;  %862 = vmatprep.mubr.bf16.mxu1 %v1381_v36 }
 0x10e   : > { %v648_v40 = vmax.f32 %v570_v33, 0.0  ;;  %v573_v41 = vadd.f32 %v1531_v37, %v572_v39 }
 0x10f   : > { %v651_v42 = vmax.f32 %v581_v38, 0.0 }
 0x110   : > { %v649_v43 = vmax.f32 %v573_v41, 0.0 }
 0x111   : > { %v673_v44 = vpack.c.bf16 %v651_v42, %v650_v35 }
 0x112   : > { %v672_v45 = vpack.c.bf16 %v649_v43, %v648_v40  ;;  %v1261_v46 = vpop.f32.mrb[20].mxu0 }
 0x113   : > { %v594_v47 = vadd.f32 %v1261_v46, %v1531_v37  ;;  %v585_v48 = vpop.f32.mrb[21].mxu0 }
 0x114   : > { %833 = vmatmul.mubr.bf16.gmra.mrb[48].mxu0 %v668_v15  ;;  %863 = vmatmul.mubr.bf16.gmra.mrb[8].mxu1 %v671_v28  ;;  %v586_v49 = vadd.f32 %v1531_v37, %v585_v48  ;;  %v1262_v50 = vpop.f32.mrb[22].mxu0 }
 0x115   : > { %872 = vmatprep.mubr.bf16.mxu1 %v1381_v36  ;;  %v654_v51 = vmax.f32 %v594_v47, 0.0  ;;  %v597_v52 = vadd.f32 %v1262_v50, %v1531_v37  ;;  %v588_v53 = vpop.f32.mrb[23].mxu0 }
 0x116   : > { %v652_v54 = vmax.f32 %v586_v49, 0.0  ;;  %v589_v55 = vadd.f32 %v1531_v37, %v588_v53 }
 0x117   : > { %v655_v56 = vmax.f32 %v597_v52, 0.0 }
 0x118   : > { %v653_v57 = vmax.f32 %v589_v55, 0.0 }
 0x119   : > { %v675_v58 = vpack.c.bf16 %v655_v56, %v654_v51 }
 0x11a   : > { %v674_v59 = vpack.c.bf16 %v653_v57, %v652_v54  ;;  %v1265_v60 = vpop.f32.mrb[24].mxu0 }
 0x11b   : > { %v610_v61 = vadd.f32 %v1265_v60, %v1531_v37  ;;  %v601_v62 = vpop.f32.mrb[25].mxu0 }
 0x11c   : > { %873 = vmatmul.mubr.bf16.gmra.mrb[12].mxu1 %v672_v45  ;;  %v602_v63 = vadd.f32 %v1531_v37, %v601_v62  ;;  %v1266_v0 = vpop.f32.mrb[26].mxu0 }
 0x11d   : > { %882 = vmatprep.mubr.bf16.mxu1 %v1381_v36  ;;  %v658_v1 = vmax.f32 %v610_v61, 0.0  ;;  %v613_v2 = vadd.f32 %v1266_v0, %v1531_v37  ;;  %v604_v3 = vpop.f32.mrb[27].mxu0 }
 0x11e   : > { %v656_v4 = vmax.f32 %v602_v63, 0.0  ;;  %v605_v5 = vadd.f32 %v1531_v37, %v604_v3 }
 0x11f   : > { %v659_v6 = vmax.f32 %v613_v2, 0.0 }
 0x120   : > { %v657_v7 = vmax.f32 %v605_v5, 0.0 }
 0x121   : > { %v677_v8 = vpack.c.bf16 %v659_v6, %v658_v1 }
 0x122   : > { %v676_v9 = vpack.c.bf16 %v657_v7, %v656_v4  ;;  %v1269_v10 = vpop.f32.mrb[28].mxu0 }
 0x123   : > { %v626_v11 = vadd.f32 %v1269_v10, %v1531_v37  ;;  %v617_v12 = vpop.f32.mrb[29].mxu0 }
 0x124   : > { %883 = vmatmul.mubr.bf16.gmra.mrb[16].mxu1 %v673_v44  ;;  %v618_v13 = vadd.f32 %v1531_v37, %v617_v12  ;;  %v1270_v14 = vpop.f32.mrb[30].mxu0 }
 0x125   : > { %892 = vmatprep.mubr.bf16.mxu1 %v1381_v36  ;;  %v662_v15 = vmax.f32 %v626_v11, 0.0  ;;  %v629_v16 = vadd.f32 %v1270_v14, %v1531_v37  ;;  %v620_v17 = vpop.f32.mrb[31].mxu0 }
 0x126   : > { %v660_v18 = vmax.f32 %v618_v13, 0.0  ;;  %v621_v19 = vadd.f32 %v1531_v37, %v620_v17 }
 0x127   : > { %v663_v20 = vmax.f32 %v629_v16, 0.0 }
 0x128   : > { %v661_v21 = vmax.f32 %v621_v19, 0.0 }
 0x129   : > { %v679_v22 = vpack.c.bf16 %v663_v20, %v662_v15 }
 0x12a   : > { %v678_v23 = vpack.c.bf16 %v661_v21, %v660_v18 }
 0x12c   : > { %893 = vmatmul.mubr.bf16.gmra.mrb[20].mxu1 %v674_v59 }
 0x12d   : > { %902 = vmatprep.mubr.bf16.mxu1 %v1381_v36 }
 0x134   : > { %903 = vmatmul.mubr.bf16.gmra.mrb[24].mxu1 %v675_v58 }
 0x135   : > { %912 = vmatprep.mubr.bf16.mxu1 %v1381_v36 }
 0x13c   : > { %913 = vmatmul.mubr.bf16.gmra.mrb[28].mxu1 %v676_v9 }
 0x13d   : > { %922 = vmatprep.mubr.bf16.mxu1 %v1381_v36 }
 0x144   : > { %923 = vmatmul.mubr.bf16.gmra.mrb[32].mxu1 %v677_v8 }
 0x145   : > { %932 = vmatprep.mubr.bf16.mxu1 %v1381_v36 }
 0x14c   : > { %933 = vmatmul.mubr.bf16.gmra.mrb[36].mxu1 %v678_v23 }
 0x14d   : > { %942 = vmatprep.mubr.bf16.mxu1 %v1381_v36 }
 0x154   : > { %943 = vmatmul.mubr.bf16.gmra.mrb[40].mxu1 %v679_v22 }
 0x1c7   : > { %v794_v37 = vpop.f32.mrb[32].mxu0 }
 0x1c8   : > { %v796_v24 = vpop.f32.mrb[33].mxu0 }
 0x1c9   : > { %v798_v25 = vpop.f32.mrb[34].mxu0 }
 0x1ca   : > { %v953_v26 = vmax.f32 %v794_v37, %v798_v25  ;;  %v800_v27 = vpop.f32.mrb[35].mxu0 }
 0x1cb   : > { %v954_v28 = vmax.f32 %v796_v24, %v800_v27 }
 0x1cf   : > { %v804_v29 = vpop.f32.mrb[36].mxu0 }
 0x1d0   : > { %v955_v30 = vmax.f32 %v953_v26, %v804_v29  ;;  %v806_v31 = vpop.f32.mrb[37].mxu0 }
 0x1d1   : > { %v956_v32 = vmax.f32 %v954_v28, %v806_v31  ;;  %v808_v33 = vpop.f32.mrb[38].mxu0 }
 0x1d2   : > { %v957_v34 = vmax.f32 %v955_v30, %v808_v33  ;;  %v810_v35 = vpop.f32.mrb[39].mxu0 }
 0x1d3   : > { %v958_v38 = vmax.f32 %v956_v32, %v810_v35 }
 0x1d6   : > { %v844_v39 = vpop.f32.mrb[0].mxu1 }
 0x1d7   : > { %v814_v40 = vpop.f32.mrb[40].mxu0  ;;  %v846_v41 = vpop.f32.mrb[1].mxu1 }
 0x1d8   : > { %v959_v42 = vmax.f32 %v957_v34, %v814_v40  ;;  %v816_v36 = vpop.f32.mrb[41].mxu0  ;;  %v848_v43 = vpop.f32.mrb[2].mxu1 }
 0x1d9   : > { %v960_v44 = vmax.f32 %v958_v38, %v816_v36  ;;  %v818_v45 = vpop.f32.mrb[42].mxu0  ;;  %v850_v46 = vpop.f32.mrb[3].mxu1 }
 0x1da   : > { %v961_v47 = vmax.f32 %v959_v42, %v818_v45  ;;  %v820_v48 = vpop.f32.mrb[43].mxu0 }
 0x1db   : > { %v962_v49 = vmax.f32 %v960_v44, %v820_v48 }
 0x1df   : > { %v824_v50 = vpop.f32.mrb[44].mxu0  ;;  %v854_v51 = vpop.f32.mrb[4].mxu1 }
 0x1e0   : > { %v963_v52 = vmax.f32 %v961_v47, %v824_v50  ;;  %v826_v53 = vpop.f32.mrb[45].mxu0  ;;  %v856_v54 = vpop.f32.mrb[5].mxu1 }
 0x1e1   : > { %v964_v55 = vmax.f32 %v962_v49, %v826_v53  ;;  %v828_v56 = vpop.f32.mrb[46].mxu0  ;;  %v858_v57 = vpop.f32.mrb[6].mxu1 }
 0x1e2   : > { %v965_v58 = vmax.f32 %v963_v52, %v828_v56  ;;  %v830_v59 = vpop.f32.mrb[47].mxu0  ;;  %v860_v60 = vpop.f32.mrb[7].mxu1 }
 0x1e3   : > { %v966_v61 = vmax.f32 %v964_v55, %v830_v59 }
 0x1e7   : > { %v834_v62 = vpop.f32.mrb[48].mxu0  ;;  %v864_v63 = vpop.f32.mrb[8].mxu1 }
 0x1e8   : > { %v967_v0 = vmax.f32 %v965_v58, %v834_v62  ;;  %v836_v1 = vpop.f32.mrb[49].mxu0  ;;  %v866_v2 = vpop.f32.mrb[9].mxu1 }
 0x1e9   : > { %v968_v3 = vmax.f32 %v966_v61, %v836_v1  ;;  %v838_v4 = vpop.f32.mrb[50].mxu0  ;;  %v868_v5 = vpop.f32.mrb[10].mxu1 }
 0x1ea   : > { %v969_v6 = vmax.f32 %v967_v0, %v838_v4  ;;  %v840_v7 = vpop.f32.mrb[51].mxu0  ;;  %v870_v8 = vpop.f32.mrb[11].mxu1 }
 0x1eb   : > { %v970_v9 = vmax.f32 %v968_v3, %v840_v7 }
 0x1ec   : > { %v971_v10 = vmax.f32 %v969_v6, %v844_v39 }
 0x1ed   : > { %v972_v11 = vmax.f32 %v970_v9, %v846_v41 }
 0x1ee   : > { %v973_v12 = vmax.f32 %v971_v10, %v848_v43 }
 0x1ef   : > { %v974_v13 = vmax.f32 %v972_v11, %v850_v46  ;;  %v874_v14 = vpop.f32.mrb[12].mxu1 }
 0x1f0   : > { %v975_v15 = vmax.f32 %v973_v12, %v854_v51  ;;  %v876_v16 = vpop.f32.mrb[13].mxu1 }
 0x1f1   : > { %v976_v17 = vmax.f32 %v974_v13, %v856_v54  ;;  %v878_v18 = vpop.f32.mrb[14].mxu1 }
 0x1f2   : > { %v977_v19 = vmax.f32 %v975_v15, %v858_v57  ;;  %v880_v20 = vpop.f32.mrb[15].mxu1 }
 0x1f3   : > { %v978_v21 = vmax.f32 %v976_v17, %v860_v60 }
 0x1f4   : > { %v979_v22 = vmax.f32 %v977_v19, %v864_v63 }
 0x1f5   : > { %v980_v23 = vmax.f32 %v978_v21, %v866_v2 }
 0x1f6   : > { %v981_v37 = vmax.f32 %v979_v22, %v868_v5 }
 0x1f7   : > { %v982_v24 = vmax.f32 %v980_v23, %v870_v8  ;;  %v884_v25 = vpop.f32.mrb[16].mxu1 }
 0x1f8   : > { %v983_v26 = vmax.f32 %v981_v37, %v874_v14  ;;  %v886_v27 = vpop.f32.mrb[17].mxu1 }
 0x1f9   : > { %v984_v28 = vmax.f32 %v982_v24, %v876_v16  ;;  %v888_v29 = vpop.f32.mrb[18].mxu1 }
 0x1fa   : > { %v985_v30 = vmax.f32 %v983_v26, %v878_v18  ;;  %v890_v31 = vpop.f32.mrb[19].mxu1 }
 0x1fb   : > { %v986_v32 = vmax.f32 %v984_v28, %v880_v20 }
 0x1fc   : > { %v987_v33 = vmax.f32 %v985_v30, %v884_v25  ;;  %v1382_v25 = vmov 1966171168  }
 0x1fd   : > { %v988_v34 = vmax.f32 %v986_v32, %v886_v27  ;;  %v1042_v26 = vunpack.c.l.s4 %v1382_v25  ;;  %v1044_v27 = vlaneseq }
 0x1fe   : > { %v989_v35 = vmax.f32 %v987_v33, %v888_v29 }
 0x1ff   : > { %v990_v38 = vmax.f32 %v988_v34, %v890_v31  ;;  %v894_v39 = vpop.f32.mrb[20].mxu1  ;;  %v1043_v32 = vunpack.c.0.s8 %v1042_v26  ;;  %v1045_v33 = vshrl.u32 %v1044_v27, 7  ;;  %vm1058_vm1 = vcmp.lt.s32.totalorder %v1044_v27, 256 }
 0x200   : > { %v991_v40 = vmax.f32 %v989_v35, %v894_v39  ;;  %v896_v41 = vpop.f32.mrb[21].mxu1 }
 0x201   : > { %v992_v42 = vmax.f32 %v990_v38, %v896_v41  ;;  %v898_v36 = vpop.f32.mrb[22].mxu1 }
 0x202   : > { %v993_v43 = vmax.f32 %v991_v40, %v898_v36  ;;  %v900_v44 = vpop.f32.mrb[23].mxu1  ;;  %v1046_v40 = vsub.s32 %v1043_v32, %v1045_v33 }
 0x203   : > { %v994_v45 = vmax.f32 %v992_v42, %v900_v44 }
 0x207   : > { %v904_v46 = vpop.f32.mrb[24].mxu1 }
 0x208   : > { %v995_v47 = vmax.f32 %v993_v43, %v904_v46  ;;  %v906_v48 = vpop.f32.mrb[25].mxu1 }
 0x209   : > { %v996_v49 = vmax.f32 %v994_v45, %v906_v48  ;;  %v908_v50 = vpop.f32.mrb[26].mxu1 }
 0x20a   : > { %v997_v51 = vmax.f32 %v995_v47, %v908_v50  ;;  %v910_v52 = vpop.f32.mrb[27].mxu1 }
 0x20b   : > { %v998_v53 = vmax.f32 %v996_v49, %v910_v52 }
 0x20f   : > { %v914_v54 = vpop.f32.mrb[28].mxu1 }
 0x210   : > { %v999_v55 = vmax.f32 %v997_v51, %v914_v54  ;;  %v916_v56 = vpop.f32.mrb[29].mxu1 }
 0x211   : > { %v1000_v57 = vmax.f32 %v998_v53, %v916_v56  ;;  %v918_v58 = vpop.f32.mrb[30].mxu1 }
 0x212   : > { %v1001_v59 = vmax.f32 %v999_v55, %v918_v58  ;;  %v920_v60 = vpop.f32.mrb[31].mxu1 }
 0x213   : > { %v1002_v61 = vmax.f32 %v1000_v57, %v920_v60 }
 0x217   : > { %v924_v62 = vpop.f32.mrb[32].mxu1 }
 0x218   : > { %v1003_v63 = vmax.f32 %v1001_v59, %v924_v62  ;;  %v926_v0 = vpop.f32.mrb[33].mxu1 }
 0x219   : > { %v1004_v1 = vmax.f32 %v1002_v61, %v926_v0  ;;  %v928_v2 = vpop.f32.mrb[34].mxu1 }
 0x21a   : > { %v1005_v3 = vmax.f32 %v1003_v63, %v928_v2  ;;  %v930_v4 = vpop.f32.mrb[35].mxu1 }
 0x21b   : > { %v1006_v5 = vmax.f32 %v1004_v1, %v930_v4 }
 0x21f   : > { %v934_v6 = vpop.f32.mrb[36].mxu1 }
 0x220   : > { %v1007_v7 = vmax.f32 %v1005_v3, %v934_v6  ;;  %v936_v8 = vpop.f32.mrb[37].mxu1 }
 0x221   : > { %v1008_v9 = vmax.f32 %v1006_v5, %v936_v8  ;;  %v938_v10 = vpop.f32.mrb[38].mxu1 }
 0x222   : > { %v1009_v11 = vmax.f32 %v1007_v7, %v938_v10  ;;  %v940_v12 = vpop.f32.mrb[39].mxu1 }
 0x223   : > { %v1010_v13 = vmax.f32 %v1008_v9, %v940_v12 }
 0x227   : > { %v944_v14 = vpop.f32.mrb[40].mxu1 }
 0x228   : > { %v1011_v15 = vmax.f32 %v1009_v11, %v944_v14  ;;  %v946_v16 = vpop.f32.mrb[41].mxu1 }
 0x229   : > { %v1012_v17 = vmax.f32 %v1010_v13, %v946_v16  ;;  %v948_v18 = vpop.f32.mrb[42].mxu1 }
 0x22a   : > { %v1013_v19 = vmax.f32 %v1011_v15, %v948_v18  ;;  %v950_v20 = vpop.f32.mrb[43].mxu1 }
 0x22b   : > { %v1014_v21 = vmax.f32 %v1012_v17, %v950_v20 }
 0x22c   : > { %v1026_v22 = vrot.slane %v1013_v19, 4 }
 0x22d   : > { %v1032_v23 = vrot.slane %v1014_v21, 4 }
 0x22e   : > { %v1027_v37 = vmax.f32 %v1013_v19, %v1026_v22 }
 0x22f   : > { %v1033_v24 = vmax.f32 %v1014_v21, %v1032_v23 }
 0x230   : > { %v1028_v28 = vrot.slane %v1027_v37, 2 }
 0x231   : > { %v1034_v29 = vrot.slane %v1033_v24, 2 }
 0x232   : > { %v1029_v30 = vmax.f32 %v1027_v37, %v1028_v28 }
 0x233   : > { %v1035_v31 = vmax.f32 %v1033_v24, %v1034_v29 }
 0x234   : > { %v1030_v34 = vrot.slane %v1029_v30, 1 }
 0x235   : > { %v1036_v35 = vrot.slane %v1035_v31, 1 }
 0x236   : > { %v1031_v38 = vmax.f32 %v1029_v30, %v1030_v34 }
 0x237   : > { %v1037_v39 = vmax.f32 %v1035_v31, %v1036_v35 }
 0x239   : > { %v1040_v41 = vcombine.low %v1031_v38, %v1037_v39 }
 0x23b   : > { %v1047_v42 = vrot.slane %v1040_v41, %v1046_v40 }
 0x23d   : > { %v1054_v36 = vrot.slane %v1047_v42, %v1046_v40 }
 0x23f   : > { %1060 = vst.msk [vmem:[%s247_s24] sm:$0x3] %vm1058_vm1, %v1054_v36 }
 0x240 PF: > { %s14_s17 = sadd.s32 1, %s1379_s17   ;;  %s1597_s15 = smov %s1375_s16 }
 0x241   : > { %p11_p5 = scmp.ge.s32.totalorder %s14_s17, 4   ;;  %s1598_s16 = smov %s1600_s18 }
 0x243   :  { %13 = sbr.rel (!%p11_p5) target bundleno = 2 (0x2), region = 74 }

</bundles_post_ra>
